<compile_context>
chip_gen: v5e
topology: v5e:2x2
jax: 0.10.0
libtpu: 0.0.40
codegen_flags: <defaults>
</compile_context>

<pallas_src>
import math
import functools

import jax
import jax.numpy as jnp
from jax.experimental import pallas as pl
from jax.experimental.pallas import tpu as pltpu


# ---------------------------------------------------------------------------
# Buffer setup — replicates PositionalEncoding.__init__ (pe is (max_len, E) f32).
# ---------------------------------------------------------------------------
def build_pe_table(max_len: int, emsize: int) -> jnp.ndarray:
    position = jnp.arange(max_len, dtype=jnp.float32)[:, None]                  # (L, 1)
    div_term = jnp.exp(
        jnp.arange(0, emsize, 2, dtype=jnp.float32) * (-math.log(10000.0) / emsize)
    )                                                                            # (E/2,)
    angles = position * div_term                                                 # (L, E/2)
    pe = jnp.zeros((max_len, emsize), dtype=jnp.float32)
    pe = pe.at[:, 0::2].set(jnp.sin(angles))
    pe = pe.at[:, 1::2].set(jnp.cos(angles))
    return pe                                                                    # (L, E)


# ---------------------------------------------------------------------------
# In-kernel helpers
# ---------------------------------------------------------------------------
def _dropout_in_kernel(y, p):
    """Dropout via TPU hardware PRNG: drop with prob p, scale survivors 1/(1-p)."""
    bits = pltpu.prng_random_bits(y.shape)
    if bits.dtype != jnp.uint32:
        bits = pltpu.bitcast(bits, jnp.uint32)
    threshold = jnp.uint32(min(int(round(p * 4294967296.0)), 4294967295))
    keep = bits >= threshold
    return jnp.where(keep, y * (1.0 / (1.0 - p)), jnp.zeros_like(y))


# ---------------------------------------------------------------------------
# Kernels (add is done in f32; cast happens at the store)
# ---------------------------------------------------------------------------
def _pe_add2d_kernel(x_ref, pe_ref, o_ref):
    # B == 1 path: x block (tS, E), pe block (tS, E) — no broadcast needed.
    o_ref[...] = (x_ref[...].astype(jnp.float32) + pe_ref[...]).astype(o_ref.dtype)


def _pe_add3d_kernel(x_ref, pe_ref, o_ref):
    # x block (tS, tB, E), pe block (tS, E) broadcast over the batch axis.
    o_ref[...] = (x_ref[...].astype(jnp.float32)
                  + pe_ref[...][:, None, :]).astype(o_ref.dtype)


def _pe_dropout2d_kernel(seed_ref, x_ref, pe_ref, o_ref, *, p):
    pltpu.prng_seed(seed_ref[0], pl.program_id(0))
    y = x_ref[...].astype(jnp.float32) + pe_ref[...]
    o_ref[...] = _dropout_in_kernel(y, p).astype(o_ref.dtype)


def _pe_dropout3d_kernel(seed_ref, x_ref, pe_ref, o_ref, *, p):
    pltpu.prng_seed(seed_ref[0], pl.program_id(0), pl.program_id(1))
    y = x_ref[...].astype(jnp.float32) + pe_ref[...][:, None, :]
    o_ref[...] = _dropout_in_kernel(y, p).astype(o_ref.dtype)


# ---------------------------------------------------------------------------
# Tile-size selection (generation-independent: sized at the HBM roofline knee)
# ---------------------------------------------------------------------------
_ROW_TILE_CAP = 1024        # beyond ~512-1024 rows a tiled f32 add gains no BW
_BUDGET_BYTES = 8 << 20     # per-pipeline-stage working-set budget
_MIN_GRID_STEPS = 8         # keep both v7x TCs busy + real prefetch/writeback overlap


def _sublane_pack(itemsize: int) -> int:
    # f32 -> 8, bf16/f16 -> 16, int8/fp8 -> 32 sublane rows per packed vreg.
    return max(8, 32 // max(int(itemsize), 1))


def _pick_s_tile(S, bytes_per_row, pack, budget=_BUDGET_BYTES):
    tS = max(1, budget // max(int(bytes_per_row), 1))
    tS = min(tS, _ROW_TILE_CAP, S)
    if S >= _MIN_GRID_STEPS * pack:
        tS = min(tS, pl.cdiv(S, _MIN_GRID_STEPS))       # guarantee >= 8 grid steps
    if tS < S:
        tS = max(pack, (tS // pack) * pack)              # unmasked packed stores
    return int(tS)


def _pick_b_tile(B, E, itemsize, pack, budget=_BUDGET_BYTES):
    def bytes_per_row(tb):
        # x tile + out tile (x dtype) + pe tile (f32), per S-row.
        return (2 * tb * itemsize + 4) * E

    tB = B
    while tB > pack and pack * bytes_per_row(tB) > budget:
        tB = max(pack, ((tB // 2) // pack) * pack)
    return int(tB), bytes_per_row(tB)


# ---------------------------------------------------------------------------
# Wrapper-level dropout fallback (tiny shapes / non-TPU backends)
# ---------------------------------------------------------------------------
def _jax_dropout(y, p, seed):
    keep = jax.random.bernoulli(jax.random.PRNGKey(seed), 1.0 - p, y.shape)
    return jnp.where(keep, y / (1.0 - p), jnp.zeros_like(y)).astype(y.dtype)


# ---------------------------------------------------------------------------
# Wrapper
# ---------------------------------------------------------------------------
def positional_encoding(x, pe_table, *, dropout_p=0.1, training=False, seed=0,
                        force_pallas=False, min_pallas_elements=1 << 15,
                        alias_x=False):
    """Forward pass of PositionalEncoding.

    x:        (S, B, E) floating point (seq-first, as in the torch module)
    pe_table: (max_len, E) float32 sinusoidal table, max_len >= S
    """
    S, B, E = x.shape
    assert pe_table.ndim == 2 and pe_table.shape[0] >= S and pe_table.shape[1] == E
    assert 0.0 <= dropout_p < 1.0, "dropout p must be in [0, 1)"

    use_dropout = training and dropout_p > 0.0
    on_tpu = jax.default_backend() == "tpu"
    pe_f32 = pe_table if pe_table.dtype == jnp.float32 else pe_table.astype(jnp.float32)

    # Tiny problems: custom-call + per-step overhead dominates — let XLA fuse.
    # TODO(synk): raise this threshold (~256K elems) on v7x where HBM is ~3.2 TB/s.
    if x.size < min_pallas_elements and not force_pallas:
        y = (x.astype(jnp.float32) + pe_f32[:S][:, None, :]).astype(x.dtype)
        return _jax_dropout(y, dropout_p, seed) if use_dropout else y

    itemsize = jnp.dtype(x.dtype).itemsize
    pack = _sublane_pack(itemsize)
    flatten = (B == 1)          # 2-D sublane-dense path; no pe broadcast at all

    if flatten:
        x_in = x.reshape(S, E)
        bytes_per_row = (2 * itemsize + 4) * E
        tS = _pick_s_tile(S, bytes_per_row, pack)
        grid = (pl.cdiv(S, tS),)
        x_spec = pl.BlockSpec((tS, E), lambda i, *_: (i, 0))
        pe_spec = pl.BlockSpec((tS, E), lambda i, *_: (i, 0))
        out_spec = pl.BlockSpec((tS, E), lambda i, *_: (i, 0))
        out_shape = jax.ShapeDtypeStruct((S, E), x.dtype)
        dims = ("parallel",)
        add_kernel, drop_kernel = _pe_add2d_kernel, _pe_dropout2d_kernel
    else:
        x_in = x
        tB, bytes_per_row = _pick_b_tile(B, E, itemsize, pack)
        tS = _pick_s_tile(S, bytes_per_row, 8)   # pe block (tS, E) is f32 -> pack 8
        grid = (pl.cdiv(S, tS), pl.cdiv(B, tB))
        x_spec = pl.BlockSpec((tS, tB, E), lambda i, j, *_: (i, j, 0))
        # pe depends only on the outer S axis -> stays VMEM-resident across B tiles.
        pe_spec = pl.BlockSpec((tS, E), lambda i, j, *_: (i, 0))
        out_spec = pl.BlockSpec((tS, tB, E), lambda i, j, *_: (i, j, 0))
        out_shape = jax.ShapeDtypeStruct((S, B, E), x.dtype)
        dims = ("parallel", "parallel")
        add_kernel, drop_kernel = _pe_add3d_kernel, _pe_dropout3d_kernel

    per_step_bytes = tS * bytes_per_row
    # Cover double-buffered x/out/pe tiles + headroom; cap for v7x's 64 MiB VMEM.
    vmem_limit = int(min(48 << 20, max(32 << 20, 2 * per_step_bytes + (8 << 20))))
    params = pltpu.CompilerParams(dimension_semantics=dims,
                                  vmem_limit_bytes=vmem_limit)
    cost = pl.CostEstimate(flops=S * B * E, transcendentals=0,
                           bytes_accessed=2 * S * B * E * itemsize + S * E * 4)

    # TPU HW PRNG has no CPU/interpret lowering; fuse dropout only on real TPUs.
    fuse_dropout = use_dropout and on_tpu

    if fuse_dropout:
        seed_arr = jnp.asarray([seed], dtype=jnp.int32)
        out = pl.pallas_call(
            functools.partial(drop_kernel, p=float(dropout_p)),
            out_shape=out_shape,
            grid_spec=pltpu.PrefetchScalarGridSpec(
                num_scalar_prefetch=1, grid=grid,
                in_specs=[x_spec, pe_spec], out_specs=out_spec),
            compiler_params=params,
            cost_estimate=cost,
            input_output_aliases=({1: 0} if alias_x else {}),   # x is arg 1 (after seed)
        )(seed_arr, x_in, pe_f32)
    else:
        out = pl.pallas_call(
            add_kernel,
            out_shape=out_shape,
            grid_spec=pltpu.PrefetchScalarGridSpec(
                num_scalar_prefetch=0, grid=grid,
                in_specs=[x_spec, pe_spec], out_specs=out_spec),
            compiler_params=params,
            cost_estimate=cost,
            input_output_aliases=({0: 0} if alias_x else {}),
        )(x_in, pe_f32)

    out = out.reshape(S, B, E) if flatten else out
    if use_dropout and not fuse_dropout:
        out = _jax_dropout(out, dropout_p, seed)
    return out


# ---------------------------------------------------------------------------
# Demo / self-test
# ---------------------------------------------------------------------------
def _reference(x, pe_table):
    S = x.shape[0]
    return (x.astype(jnp.float32) + pe_table[:S][:, None, :]).astype(x.dtype)


if __name__ == "__main__":
    key = jax.random.PRNGKey(0)
    k1, k2, k3 = jax.random.split(key, 3)
    p = 0.5

    # --- Small shape consistent with the module (seq=8, batch=2, emsize=32):
    #     exercises the 3-D path with an in-kernel pe broadcast.
    S1, B1, E1, L1 = 8, 2, 32, 64
    x1 = jax.random.normal(k1, (S1, B1, E1), dtype=jnp.float32)
    pe1 = build_pe_table(L1, E1)

    out1 = jax.block_until_ready(
        positional_encoding(x1, pe1, dropout_p=0.1, training=False, force_pallas=True))
    ref1 = _reference(x1, pe1)
    assert out1.shape == x1.shape and out1.dtype == x1.dtype
    assert jnp.allclose(out1, ref1, atol=1e-6, rtol=1e-6)

    tr1 = jax.block_until_ready(
        positional_encoding(x1, pe1, dropout_p=p, training=True, seed=123,
                            force_pallas=True))
    nz1 = tr1 != 0.0
    drop_frac1 = float(jnp.mean(jnp.logical_not(nz1).astype(jnp.float32)))
    assert 0.02 < drop_frac1 < 0.98
    assert jnp.allclose(jnp.where(nz1, tr1, 0.0),
                        jnp.where(nz1, ref1 / (1.0 - p), 0.0), atol=1e-5, rtol=1e-5)

    # --- Medium shape exercising the tiled 3-D path with a multi-step grid.
    S2, B2, E2, L2 = 64, 8, 128, 128
    x2 = jax.random.normal(k2, (S2, B2, E2), dtype=jnp.float32)
    pe2 = build_pe_table(L2, E2)

    out2 = jax.block_until_ready(
        positional_encoding(x2, pe2, dropout_p=0.1, training=False))
    ref2 = _reference(x2, pe2)
    assert jnp.allclose(out2, ref2, atol=1e-6, rtol=1e-6)

    tr2 = jax.block_until_ready(
        positional_encoding(x2, pe2, dropout_p=p, training=True, seed=7))
    nz2 = tr2 != 0.0
    drop_frac2 = float(jnp.mean(jnp.logical_not(nz2).astype(jnp.float32)))
    assert 0.1 < drop_frac2 < 0.9
    assert jnp.allclose(jnp.where(nz2, tr2, 0.0),
                        jnp.where(nz2, ref2 / (1.0 - p), 0.0), atol=1e-5, rtol=1e-5)

    # --- Batch-1 shape: exercises the sublane-dense 2-D path (no broadcast).
    S3, B3, E3, L3 = 64, 1, 64, 64
    x3 = jax.random.normal(k3, (S3, B3, E3), dtype=jnp.float32)
    pe3 = build_pe_table(L3, E3)
    out3 = jax.block_until_ready(
        positional_encoding(x3, pe3, dropout_p=0.1, training=False, force_pallas=True))
    ref3 = _reference(x3, pe3)
    assert out3.shape == x3.shape
    assert jnp.allclose(out3, ref3, atol=1e-6, rtol=1e-6)

    print("KERNEL_OK")
</pallas_src>

<mosaic_0001>
module attributes {stable_mosaic.version = 11 : i64} {
  func.func @_pe_add3d_kernel(%arg0: i32, %arg1: i32, %arg2: memref<8x2x32xf32, #tpu.memory_space<vmem>>, %arg3: memref<8x32xf32, #tpu.memory_space<vmem>>, %arg4: memref<8x2x32xf32, #tpu.memory_space<vmem>>) attributes {dimension_semantics = [#tpu.dimension_semantics<parallel>, #tpu.dimension_semantics<parallel>], iteration_bounds = array<i64: 1, 1>, scalar_prefetch = 0 : i64, scratch_operands = 0 : i64, tpu.core_type = #tpu.core_type<tc>, window_params = [{transform_indices = @transform_0, window_bounds = array<i64: 8, 2, 32>}, {transform_indices = @transform_1, window_bounds = array<i64: 8, 32>}, {transform_indices = @transform_2, window_bounds = array<i64: 8, 2, 32>}]} {
    %c0 = arith.constant 0 : index
    %c0_0 = arith.constant 0 : index
    %c0_1 = arith.constant 0 : index
    %0 = vector.load %arg2[%c0, %c0_0, %c0_1] : memref<8x2x32xf32, #tpu.memory_space<vmem>>, vector<8x2x32xf32>
    %c0_2 = arith.constant 0 : index
    %c0_3 = arith.constant 0 : index
    %1 = vector.load %arg3[%c0_2, %c0_3] : memref<8x32xf32, #tpu.memory_space<vmem>>, vector<8x32xf32>
    %2 = vector.shape_cast %1 : vector<8x32xf32> to vector<8x1x32xf32>
    %3 = vector.broadcast %2 : vector<8x1x32xf32> to vector<8x2x32xf32>
    %4 = arith.addf %0, %3 : vector<8x2x32xf32>
    %c0_4 = arith.constant 0 : index
    %c0_5 = arith.constant 0 : index
    %c0_6 = arith.constant 0 : index
    %5 = vector.load %arg4[%c0_4, %c0_5, %c0_6] : memref<8x2x32xf32, #tpu.memory_space<vmem>>, vector<8x2x32xf32>
    tpu.vector_store %arg4[%c0_4, %c0_5, %c0_6], %4 {strides = array<i32>} : memref<8x2x32xf32, #tpu.memory_space<vmem>>, vector<8x2x32xf32>,
    return
  }
  func.func @transform_0(%arg0: i32, %arg1: i32) -> (i32, i32, i32) {
    %c0_i32 = arith.constant 0 : i32
    %c0_i32_0 = arith.constant 0 : i32
    return %arg0, %arg1, %c0_i32 : i32, i32, i32
  }
  func.func @transform_1(%arg0: i32, %arg1: i32) -> (i32, i32) {
    %c0_i32 = arith.constant 0 : i32
    %c0_i32_0 = arith.constant 0 : i32
    return %arg0, %c0_i32 : i32, i32
  }
  func.func @transform_2(%arg0: i32, %arg1: i32) -> (i32, i32, i32) {
    %c0_i32 = arith.constant 0 : i32
    %c0_i32_0 = arith.constant 0 : i32
    return %arg0, %arg1, %c0_i32 : i32, i32, i32
  }
}

</mosaic_0001>

<bundles_post_ra>
// kernel: tpu_custom_call.1
= control target key start
LH: loop header
LB: loop body
LE: loop exit
PB: predicated region body
PF: predicated region fallthrough
CT: control target
= control target key end

     0   :  { %vm53_vm0 = vcmask 254976   ;;  %s165_s0 = inlined_call_operand.vmem [shape: f32[8,2,32], index: 0, kind: input, shape index: {}]   ;;  %s166_s1 = inlined_call_operand.vmem [shape: f32[64,32], index: 1, kind: input, shape index: {}]   ;;  %s167_s2 = inlined_call_operand.hbm [shape: f32[8,2,32], index: 2, kind: output, shape index: {}]  }
   0x1   :  { %v12_v0 = vld [vmem:[%s165_s0] sm:$0x3]  ;;  %v13_v2 = vld [vmem:[%s165_s0 + $0x2] sm:$0x3]  ;;  %v14_v5 = vld [vmem:[%s165_s0 + $0x4] sm:$0x3] }
   0x2   :  { %v20_v1 = vld [vmem:[%s166_s1] sm:$0xff]  ;;  %v16_v9 = vld [vmem:[%s165_s0 + $0x8] sm:$0x3]  ;;  %v17_v16 = vld [vmem:[%s165_s0 + $0xa] sm:$0x3] }
   0x3   :  { %v29_v3 = vperm.slane %v20_v1, 0  ;;  %v22_v4 = vrot.slane %v20_v1, 1  ;;  %v23_v6 = vrot.slane %v20_v1, 2  ;;  %v24_v7 = vrot.slane %v20_v1, 3  ;;  %v15_v8 = vld [vmem:[%s165_s0 + $0x6] sm:$0x3] }
   0x4   :  { %v25_v10 = vrot.slane %v20_v1, 4  ;;  %v26_v11 = vrot.slane %v20_v1, 5  ;;  %v27_v19 = vrot.slane %v20_v1, 6  ;;  %v28_v20 = vrot.slane %v20_v1, 7  ;;  %v18_v24 = vld [vmem:[%s165_s0 + $0xc] sm:$0x3] }
   0x5   :  { %v45_v12 = vadd.f32 %v29_v3, %v12_v0  ;;  %v30_v13 = vperm.slane %v22_v4, 0  ;;  %v31_v14 = vperm.slane %v23_v6, 0  ;;  %v32_v15 = vperm.slane %v24_v7, 0 }
   0x6   :  { %v33_v17 = vperm.slane %v25_v10, 0  ;;  %v34_v18 = vperm.slane %v26_v11, 0 }
   0x7   :  { %54 = vst.msk [vmem:[#allocation2] sm:$0x3] %vm53_vm0, %v45_v12  ;;  %v46_v21 = vadd.f32 %v30_v13, %v13_v2  ;;  %v47_v22 = vadd.f32 %v31_v14, %v14_v5  ;;  %v48_v23 = vadd.f32 %v32_v15, %v15_v8 }
   0x8   :  { %7 = vsyncpa [#allocation3], 0  ;;  %v49_v25 = vadd.f32 %v33_v17, %v16_v9  ;;  %v35_v26 = vperm.slane %v27_v19, 0  ;;  %v19_v27 = vld [vmem:[%s165_s0 + $0xe] sm:$0x3]  ;;  %v36_v28 = vperm.slane %v28_v20, 0  ;;  %v50_v29 = vadd.f32 %v34_v18, %v17_v16 }
   0x9   :  { %55 = vst.msk [vmem:[#allocation2 + $0x2] sm:$0x3] %vm53_vm0, %v46_v21  ;;  %s109_s26 = smov [#allocation2]   ;;  %s68_s30 = sshll.u32 %s167_s2, 4  ;;  %s69_s30 = int_to_ptr.hbm [resolvable:$true] %s68_s30 }
   0xa   :  { %s66_s27 = sshll.u32 %s109_s26, 4  ;;  %56 = vst.msk [vmem:[#allocation2 + $0x4] sm:$0x3] %vm53_vm0, %v47_v22  ;;  %v51_v30 = vadd.f32 %v35_v26, %v18_v24  ;;  %v52_v31 = vadd.f32 %v36_v28, %v19_v27  ;;  %s110_s0 = smov 32   ;;  %s67_s27 = int_to_ptr.vmem [resolvable:$true] %s66_s27 }
   0xb   :  { %57 = vst.msk [vmem:[#allocation2 + $0x6] sm:$0x3] %vm53_vm0, %v48_v23  ;;  %s111_s3 = smov 2  }
   0xc   :  { %58 = vst.msk [vmem:[#allocation2 + $0x8] sm:$0x3] %vm53_vm0, %v49_v25 }
   0xd   :  { %59 = vst.msk [vmem:[#allocation2 + $0xa] sm:$0x3] %vm53_vm0, %v50_v29 }
   0xe   :  { %60 = vst.msk [vmem:[#allocation2 + $0xc] sm:$0x3] %vm53_vm0, %v51_v30 }
   0xf   :  { %61 = vst.msk [vmem:[#allocation2 + $0xe] sm:$0x3] %vm53_vm0, %v52_v31 }
  0x10   :  { %74 = dma.vmem_to_hbm [thread:$0]  %s67_s27, 256, %s69_s30, [#allocation3], %s110_s0, %s110_s0, %s111_s3  }
  0x11   :  { %107 = dma.done.wait [#allocation3], 256  }
  0x12   :  { %108 = vsyncadd [#allocation3], 4294967040 }
  0x13   :  { %79 = vsyncpa [#allocation3], 1 }

</bundles_post_ra>
